<compile_context>
chip_gen: v7x
topology: tpu7x:2x2x1
jax: 0.10.0
libtpu: 0.0.40
codegen_flags: <defaults>
</compile_context>

<pallas_src>
import jax
import jax.numpy as jnp
from jax.experimental import pallas as pl
from jax.experimental.pallas import tpu as pltpu

IN_FEATURES = 3
OUT_FEATURES = 8


def _model_kernel(x_ref, p_ref, o_ref):
    # x_ref: (N, 3) f32
    # p_ref: (4, 8) f32  -- rows 0..2 = W^T (in, out), row 3 = bias
    # o_ref: (N, 8) f32
    x = x_ref[...]

    # v2 = x @ W^T + b, unrolled over K=3 on the VPU.
    acc = p_ref[IN_FEATURES:IN_FEATURES + 1, :]           # bias row (1, 8), broadcasts over N
    for k in range(IN_FEATURES):
        acc = acc + x[:, k:k + 1] * p_ref[k:k + 1, :]     # (N,1)*(1,8) -> (N,8), all VPU

    # v4 = (v2 + 1) + v2 == 2*v2 + 1  (kept in-kernel for bit-exact rounding order)
    o_ref[...] = 2.0 * acc + 1.0


def pack_params(weight, bias):
    """One-time layout prep + operand coalescing (NOT in the per-call path).

    weight: (out, in) PyTorch layout, bias: (out,)
    Returns a single (in + 1, out) slab: rows 0..in-1 = W^T, row in = bias.
    """
    w_t = weight.T.astype(jnp.float32)                    # (in, out)
    b_row = bias.reshape(1, -1).astype(jnp.float32)       # (1, out)
    return jnp.concatenate([w_t, b_row], axis=0)          # (in+1, out)


@jax.jit
def model_forward(x, params):
    """x: (N, 3) f32, params: (4, 8) f32 packed [W^T ; b]."""
    n = x.shape[0]
    out_features = params.shape[1]
    return pl.pallas_call(
        _model_kernel,
        out_shape=jax.ShapeDtypeStruct((n, out_features), jnp.float32),
        in_specs=[
            pl.BlockSpec(memory_space=pltpu.VMEM),
            pl.BlockSpec(memory_space=pltpu.VMEM),
        ],
        out_specs=pl.BlockSpec(memory_space=pltpu.VMEM),
    )(x, params)


if __name__ == "__main__":
    key = jax.random.PRNGKey(0)
    kx, kw, kb = jax.random.split(key, 3)

    # Deterministic parameter init (mimic PyTorch Linear's U(-1/sqrt(fan_in), +1/sqrt(fan_in)))
    bound = 1.0 / (IN_FEATURES ** 0.5)
    weight = jax.random.uniform(kw, (OUT_FEATURES, IN_FEATURES),
                                minval=-bound, maxval=bound, dtype=jnp.float32)
    bias = jax.random.uniform(kb, (OUT_FEATURES,),
                              minval=-bound, maxval=bound, dtype=jnp.float32)

    # One-time pack (layout prep + operand coalescing); done at "init", not per call.
    params = jax.device_put(pack_params(weight, bias))

    # Input consistent with the module: x1 = torch.randn(1, 3)
    x1 = jax.random.normal(kx, (1, IN_FEATURES), dtype=jnp.float32)

    out = model_forward(x1, params)
    out = jax.block_until_ready(out)

    # Pure-JAX reference check against the original module semantics.
    v2_ref = x1 @ weight.T + bias
    ref = 2.0 * v2_ref + 1.0
    assert out.shape == (1, OUT_FEATURES)
    assert jnp.allclose(out, ref, atol=1e-5, rtol=1e-5)

    print("KERNEL_OK")
</pallas_src>

<mosaic_0001>
module attributes {stable_mosaic.version = 11 : i64} {
  func.func @_model_kernel(%arg0: memref<1x3xf32, #tpu.memory_space<vmem>>, %arg1: memref<4x8xf32, #tpu.memory_space<vmem>>, %arg2: memref<1x8xf32, #tpu.memory_space<vmem>>) attributes {dimension_semantics = [], scalar_prefetch = 0 : i64, scratch_operands = 0 : i64, tpu.core_type = #tpu.core_type<tc>} {
    %c0 = arith.constant 0 : index
    %c0_0 = arith.constant 0 : index
    %0 = vector.load %arg0[%c0, %c0_0] : memref<1x3xf32, #tpu.memory_space<vmem>>, vector<1x3xf32>
    %c3 = arith.constant 3 : index
    %c0_1 = arith.constant 0 : index
    %1 = vector.load %arg1[%c3, %c0_1] : memref<4x8xf32, #tpu.memory_space<vmem>>, vector<1x8xf32>
    %2 = vector.extract_strided_slice %0 {offsets = [0, 0], sizes = [1, 1], strides = [1, 1]} : vector<1x3xf32> to vector<1x1xf32>
    %c0_2 = arith.constant 0 : index
    %c0_3 = arith.constant 0 : index
    %3 = vector.load %arg1[%c0_2, %c0_3] : memref<4x8xf32, #tpu.memory_space<vmem>>, vector<1x8xf32>
    %4 = vector.broadcast %2 : vector<1x1xf32> to vector<1x8xf32>
    %5 = arith.mulf %4, %3 : vector<1x8xf32>
    %6 = arith.addf %1, %5 : vector<1x8xf32>
    %7 = vector.extract_strided_slice %0 {offsets = [0, 1], sizes = [1, 1], strides = [1, 1]} : vector<1x3xf32> to vector<1x1xf32>
    %c1 = arith.constant 1 : index
    %c0_4 = arith.constant 0 : index
    %8 = vector.load %arg1[%c1, %c0_4] : memref<4x8xf32, #tpu.memory_space<vmem>>, vector<1x8xf32>
    %9 = vector.broadcast %7 : vector<1x1xf32> to vector<1x8xf32>
    %10 = arith.mulf %9, %8 : vector<1x8xf32>
    %11 = arith.addf %6, %10 : vector<1x8xf32>
    %12 = vector.extract_strided_slice %0 {offsets = [0, 2], sizes = [1, 1], strides = [1, 1]} : vector<1x3xf32> to vector<1x1xf32>
    %c2 = arith.constant 2 : index
    %c0_5 = arith.constant 0 : index
    %13 = vector.load %arg1[%c2, %c0_5] : memref<4x8xf32, #tpu.memory_space<vmem>>, vector<1x8xf32>
    %14 = vector.broadcast %12 : vector<1x1xf32> to vector<1x8xf32>
    %15 = arith.mulf %14, %13 : vector<1x8xf32>
    %16 = arith.addf %11, %15 : vector<1x8xf32>
    %cst = arith.constant 2.000000e+00 : f32
    %17 = vector.broadcast %cst : f32 to vector<1x8xf32>
    %18 = arith.mulf %17, %16 : vector<1x8xf32>
    %cst_6 = arith.constant 1.000000e+00 : f32
    %19 = vector.broadcast %cst_6 : f32 to vector<1x8xf32>
    %20 = arith.addf %18, %19 : vector<1x8xf32>
    %c0_7 = arith.constant 0 : index
    %c0_8 = arith.constant 0 : index
    %21 = vector.load %arg2[%c0_7, %c0_8] : memref<1x8xf32, #tpu.memory_space<vmem>>, vector<1x8xf32>
    tpu.vector_store %arg2[%c0_7, %c0_8], %20 {strides = array<i32>} : memref<1x8xf32, #tpu.memory_space<vmem>>, vector<1x8xf32>,
    return
  }
}

</mosaic_0001>

<bundles_post_ra>
// kernel: model_forward.1
= control target key start
LH: loop header
LB: loop body
LE: loop exit
PB: predicated region body
PF: predicated region fallthrough
CT: control target
= control target key end

     0   :  { %7 = vsyncpa [#allocation3], 0  ;;  %s231_s0 = inlined_call_operand.hbm [shape: f32[1,3], index: 0, kind: input, shape index: {}]   ;;  %s232_s1 = inlined_call_operand.hbm [shape: f32[4,8], index: 1, kind: input, shape index: {}]   ;;  %s233_s2 = inlined_call_operand.hbm [shape: f32[1,8], index: 2, kind: output, shape index: {}]  }
   0x1   :  { %8 = vsyncpa [#allocation6], 0 }
   0x2   :  { %9 = vsyncpa [#allocation4], 0  ;;  %s174_s9 = smov [#allocation2]   ;;  %s175_s11 = smov [#allocation5]  }
   0x3   :  { %s16_s10 = sshll.u32 %s174_s9, 4  ;;  %s26_s12 = sshll.u32 %s175_s11, 4  ;;  %s17_s10 = int_to_ptr.vmem [resolvable:$true] %s16_s10  ;;  %s27_s12 = int_to_ptr.vmem [resolvable:$true] %s26_s12 }
   0x4   :  { %s102_s15 = scalar_lea.hbm %s231_s0, 16 }
   0x5   :  { %p103_p0 = scmp.ne.s32.totalorder %s231_s0, %s102_s15  ;;  %p106_p1 = scmp.lt.u32.totalorder %s102_s15, %s231_s0 }
   0x7   :  { %p108_p2 = pnand %p106_p1, %p103_p0 }
   0x9   :  { %111 = shalt.err (!%p108_p2)
}
   0xa   :  { %s112_s20 = scalar_lea.vmem %s17_s10, 16  ;;  %s116_s21 = scalar_lea.vmem %s17_s10, 32 }
   0xb   :  { %p113_p3 = scmp.ne.s32.totalorder %s17_s10, %s112_s20  ;;  %p117_p4 = scmp.lt.s32.totalorder %s17_s10, %s17_s10 }
   0xc   :  { %p118_p5 = scmp.lt.s32.totalorder %s116_s21, %s112_s20 }
   0xe   :  { %p119_p6 = por %p118_p5, %p117_p4 }
  0x10   :  { %p120_p7 = pnand %p119_p6, %p113_p3 }
  0x12   :  { %123 = shalt.err (!%p120_p7)
}
  0x13   :  { %19 = dma.hbm_to_vmem [thread:$0]  %s231_s0, 16, %s17_s10, [#allocation3]  }
  0x14   :  { %s124_s26 = scalar_lea.hbm %s232_s1, 64 }
  0x15   :  { %p125_p8 = scmp.ne.s32.totalorder %s232_s1, %s124_s26  ;;  %p128_p9 = scmp.lt.u32.totalorder %s124_s26, %s232_s1 }
  0x17   :  { %p130_p10 = pnand %p128_p9, %p125_p8 }
  0x19   :  { %133 = shalt.err (!%p130_p10)
}
  0x1a   :  { %s134_s3 = scalar_lea.vmem %s27_s12, 64  ;;  %p139_p12 = scmp.lt.s32.totalorder %s27_s12, %s27_s12 }
  0x1b   :  { %p135_p11 = scmp.ne.s32.totalorder %s27_s12, %s134_s3  ;;  %p140_p13 = scmp.lt.s32.totalorder %s134_s3, %s134_s3 }
  0x1d   :  { %p141_p0 = por %p140_p13, %p139_p12 }
  0x1f   :  { %p142_p1 = pnand %p141_p0, %p135_p11 }
  0x21   :  { %145 = shalt.err (!%p142_p1)
}
  0x22   :  { %29 = dma.hbm_to_vmem [thread:$0]  %s232_s1, 64, %s27_s12, [#allocation6]  }
  0x23   :  { %168 = dma.done.wait [#allocation3], 16  }
  0x24   :  { %169 = vsyncadd [#allocation3], 4294967280 }
  0x25   :  { %170 = dma.done.wait [#allocation6], 64  }
  0x26   :  { %171 = vsyncadd [#allocation6], 4294967232  ;;  %v176_v0 = vmov 0   ;;  %v177_v1 = vmov 2   ;;  %v36_v2 = vld [vmem:[#allocation2] sm:$0x1]  ;;  %v44_v4 = vlaneseq }
  0x27   :  { %98 = vset.pattern.permute.xlu0 %v176_v0  ;;  %100 = vset.pattern.permute.xlu1 %v177_v1  ;;  %v178_v3 = vmov 1   ;;  %v38_v8 = vld [vmem:[#allocation5] sm:$0x1]  ;;  %v37_v13 = vld [vmem:[#allocation5 + $0x3] sm:$0x1]  ;;  %s179_s1 = smov [#allocation7]  }
  0x28   :  { %41 = vperm.xlu0 %98, %v36_v2   ;;  %63 = vperm.xlu1 %100, %v36_v2   ;;  %v45_v5 = vshrl.u32 %v44_v4, 7  ;;  %v50_v14 = vld [vmem:[#allocation5 + $0x1] sm:$0x1]  ;;  %v61_v16 = vld [vmem:[#allocation5 + $0x2] sm:$0x1]  ;;  %s82_s5 = sshll.u32 %s179_s1, 4  ;;  %s83_s5 = int_to_ptr.vmem [resolvable:$true] %s82_s5 }
  0x29   :  { %vm74_vm0 = vcmask 57344   ;;  %s146_s6 = scalar_lea.vmem %s83_s5, 16  ;;  %s150_s7 = scalar_lea.vmem %s83_s5, 32 }
  0x2a   :  { %v46_v6 = vsub.s32 0, %v45_v5  ;;  %p147_p2 = scmp.ne.s32.totalorder %s83_s5, %s146_s6  ;;  %p151_p3 = scmp.lt.s32.totalorder %s83_s5, %s83_s5 }
  0x2b   :  { %p152_p4 = scmp.lt.s32.totalorder %s150_s7, %s146_s6 }
  0x2c   :  { %99 = vset.pattern.permute.xlu0 %v178_v3 }
  0x2d   :  { %52 = vperm.xlu0 %99, %v36_v2   ;;  %p153_p5 = por %p152_p4, %p151_p3 }
  0x2f   :  { %p154_p6 = pnand %p153_p5, %p147_p2 }
  0x31   :  { %101 = vset.pattern.permute.xlu0 %v177_v1 }
  0xa7   :  { %v42_v7 = vpop.permute.xlu0 %41  ;;  %v64_v10 = vpop.permute.xlu1 %63 }
  0xa8   :  { %v47_v9 = vrot.slane %v42_v7, %v46_v6  ;;  %v69_v12 = vrot.slane %v64_v10, %v46_v6 }
  0xaa   :  { %v48_v11 = vmul.f32 %v47_v9, %v38_v8  ;;  %v70_v20 = vmul.f32 %v69_v12, %v61_v16 }
  0xac   :  { %v53_v15 = vpop.permute.xlu0 %52  ;;  %v49_v18 = vadd.f32 %v48_v11, %v37_v13 }
  0xad   :  { %v58_v17 = vrot.slane %v53_v15, %v46_v6 }
  0xaf   :  { %v59_v19 = vmul.f32 %v58_v17, %v50_v14 }
  0xb1   :  { %v60_v21 = vadd.f32 %v59_v19, %v49_v18 }
  0xb3   :  { %v71_v22 = vadd.f32 %v70_v20, %v60_v21 }
  0xb5   :  { %v72_v23 = vmul.f32 2.0, %v71_v22 }
  0xb7   :  { %v73_v24 = vadd.f32 1.0, %v72_v23 }
  0xb9   :  { %75 = vst.msk [vmem:[#allocation7] sm:$0x1] %vm74_vm0, %v73_v24 }
  0xba   :  { %157 = shalt.err (!%p154_p6)
}
  0xbb   :  { %s158_s10 = scalar_lea.hbm %s233_s2, 16 }
  0xbc   :  { %p159_p7 = scmp.ne.s32.totalorder %s233_s2, %s158_s10  ;;  %p162_p8 = scmp.lt.u32.totalorder %s158_s10, %s233_s2 }
  0xbe   :  { %p164_p9 = pnand %p162_p8, %p159_p7 }
  0xc0   :  { %167 = shalt.err (!%p164_p9)
}
  0xc1   :  { %85 = dma.vmem_to_hbm [thread:$0]  %s83_s5, 16, %s233_s2, [#allocation4]  }
  0xc2   :  { %172 = dma.done.wait [#allocation4], 16  }
  0xc3   :  { %173 = vsyncadd [#allocation4], 4294967280 }
  0xc4   :  { %89 = vsyncpa [#allocation3], 1 }
  0xc5   :  { %90 = vsyncpa [#allocation6], 1 }
  0xc6   :  { %91 = vsyncpa [#allocation4], 1 }

</bundles_post_ra>
